<compile_context>
chip_gen: v7x
topology: tpu7x:2x2x1
jax: 0.10.0
libtpu: 0.0.40
codegen_flags: <defaults>
</compile_context>

<pallas_src>
import jax
import jax.numpy as jnp
from jax.experimental import pallas as pl
from jax.experimental.pallas import tpu as pltpu

_LANE = 128
# Minimum legal sublane multiple per element width.
_MIN_SUBLANES = {4: 8, 2: 16, 1: 32}


def _scale_kernel(w_ref, x_ref, o_ref):
    # w_ref: (1, 1) weight in SMEM (scalar path; a 1x1 contraction on the MXU
    #        would only add drain latency).
    # x_ref / o_ref: (tn, 128) lane-dense tiles of the flattened input/output.
    o_ref[...] = x_ref[...] * w_ref[0, 0]


def linear_pallas(x, w, *, block_rows=4096):
    """nn.Linear(1, 1, bias=False) forward: x (N, 1), w (1, 1) -> (N, 1)."""
    n, k = x.shape
    o, k2 = w.shape
    assert k == 1 and k2 == 1 and o == 1

    itemsize = jnp.dtype(x.dtype).itemsize
    min_rows = _MIN_SUBLANES.get(itemsize, 8)

    # Lane-dense view (rows, 128).  If N % 128 == 0 this is a free bitcast;
    # otherwise pad the tail (only extra-copy path, <= 127 elements of waste).
    rows = pl.cdiv(n, _LANE)
    padded = rows * _LANE
    flat = x.reshape(-1)
    needs_pad = padded != n
    if needs_pad:
        flat = jnp.pad(flat, (0, padded - n))
    x2d = flat.reshape(rows, _LANE)

    # Row-tile size:
    #   - tiny inputs: single full-extent block (always a legal block shape).
    #   - large inputs: ~block_rows rows per tile (multiple of the dtype's
    #     sublane packing), but at least ~4 grid steps so the "parallel" axis
    #     can shard across v7x's two TensorCores.
    tiny = rows * _LANE * itemsize <= (256 << 10)
    if tiny or rows <= min_rows:
        tn = rows
    else:
        target = min(block_rows, max(min_rows, pl.cdiv(rows, 4)))
        tn = max(min_rows, (target // min_rows) * min_rows)
        tn = min(tn, rows)
    grid = (pl.cdiv(rows, tn),)

    # Double-buffered in + out tiles (4x tile) plus headroom; keeps large
    # tiles legal on v5e (16 MiB default scoped VMEM) and is well under every
    # generation's physical VMEM.
    tile_bytes = tn * _LANE * itemsize
    vmem_limit = int(max(4 * tile_bytes + (1 << 20), 16 << 20))

    out2d = pl.pallas_call(
        _scale_kernel,
        out_shape=jax.ShapeDtypeStruct((rows, _LANE), x.dtype),
        grid=grid,
        in_specs=[
            # Weight stays whole in SMEM; kernel reads it as a scalar.
            pl.BlockSpec(memory_space=pltpu.MemorySpace.SMEM),
            pl.BlockSpec((tn, _LANE), lambda i: (i, 0)),
        ],
        out_specs=pl.BlockSpec((tn, _LANE), lambda i: (i, 0)),
        compiler_params=pltpu.CompilerParams(
            dimension_semantics=("parallel",),
            vmem_limit_bytes=vmem_limit,
        ),
    )(w, x2d)

    out_flat = out2d.reshape(-1)
    if needs_pad:
        out_flat = out_flat[:n]
    return out_flat.reshape(n, 1)


if __name__ == "__main__":
    key = jax.random.PRNGKey(0)
    k_small, k_tail, k_big = jax.random.split(key, 3)

    # LinearModel: fc1 = nn.Linear(1, 1, bias=False); weight filled with 1.0
    in_features, out_features = 1, 1
    weight = jnp.full((out_features, in_features), 1.0, dtype=jnp.float32)

    # Small input matching the module: (batch, in_features) = (8, 1).
    x = jax.random.normal(k_small, (8, in_features), dtype=jnp.float32)
    out = jax.block_until_ready(linear_pallas(x, weight))
    ref = x @ weight.T
    assert out.shape == (8, out_features)
    assert jnp.allclose(out, ref, atol=1e-6), (out, ref)

    # Tail (N % 128 != 0) path: pad + slice only here.
    x_tail = jax.random.normal(k_tail, (2000, in_features), dtype=jnp.float32)
    out_tail = jax.block_until_ready(linear_pallas(x_tail, weight))
    assert out_tail.shape == (2000, out_features)
    assert jnp.allclose(out_tail, x_tail @ weight.T, atol=1e-6)

    # No-pad, multi-grid-step path: N multiple of 128, rows > tiny threshold
    # -> lane-dense bitcast view, >= 4 grid steps, no wrapper copies.
    x_big = jax.random.normal(k_big, (1024 * 128, in_features), dtype=jnp.float32)
    out_big = jax.block_until_ready(linear_pallas(x_big, weight))
    assert out_big.shape == (1024 * 128, out_features)
    assert jnp.allclose(out_big, x_big @ weight.T, atol=1e-6)

    print("KERNEL_OK")
</pallas_src>

<mosaic_0001>
module attributes {stable_mosaic.version = 11 : i64} {
  func.func @_scale_kernel(%arg0: i32, %arg1: memref<1x1xf32, #tpu.memory_space<smem>>, %arg2: memref<1x128xf32, #tpu.memory_space<vmem>>, %arg3: memref<1x128xf32, #tpu.memory_space<vmem>>) attributes {dimension_semantics = [#tpu.dimension_semantics<parallel>], iteration_bounds = array<i64: 1>, scalar_prefetch = 0 : i64, scratch_operands = 0 : i64, tpu.core_type = #tpu.core_type<tc>, window_params = [{transform_indices = @transform_0, window_bounds = array<i64: 1, 1>}, {transform_indices = @transform_1, window_bounds = array<i64: 1, 128>}, {transform_indices = @transform_2, window_bounds = array<i64: 1, 128>}]} {
    %c0 = arith.constant 0 : index
    %c0_0 = arith.constant 0 : index
    %0 = vector.load %arg2[%c0, %c0_0] : memref<1x128xf32, #tpu.memory_space<vmem>>, vector<1x128xf32>
    %c0_1 = arith.constant 0 : index
    %c0_2 = arith.constant 0 : index
    %1 = memref.load %arg1[%c0_1, %c0_2] : memref<1x1xf32, #tpu.memory_space<smem>>
    %2 = vector.broadcast %1 : f32 to vector<1x128xf32>
    %3 = arith.mulf %0, %2 : vector<1x128xf32>
    %c0_3 = arith.constant 0 : index
    %c0_4 = arith.constant 0 : index
    %4 = vector.load %arg3[%c0_3, %c0_4] : memref<1x128xf32, #tpu.memory_space<vmem>>, vector<1x128xf32>
    tpu.vector_store %arg3[%c0_3, %c0_4], %3 {strides = array<i32>} : memref<1x128xf32, #tpu.memory_space<vmem>>, vector<1x128xf32>,
    return
  }
  func.func @transform_0(%arg0: i32) -> (i32, i32) {
    %c0_i32 = arith.constant 0 : i32
    %c0_i32_0 = arith.constant 0 : i32
    %c0_i32_1 = arith.constant 0 : i32
    return %c0_i32, %c0_i32_0 : i32, i32
  }
  func.func @transform_1(%arg0: i32) -> (i32, i32) {
    %c0_i32 = arith.constant 0 : i32
    %c0_i32_0 = arith.constant 0 : i32
    return %arg0, %c0_i32 : i32, i32
  }
  func.func @transform_2(%arg0: i32) -> (i32, i32) {
    %c0_i32 = arith.constant 0 : i32
    %c0_i32_0 = arith.constant 0 : i32
    return %arg0, %c0_i32 : i32, i32
  }
}

</mosaic_0001>

<bundles_post_ra>
// kernel: tpu_custom_call.1
= control target key start
LH: loop header
LB: loop body
LE: loop exit
PB: predicated region body
PF: predicated region fallthrough
CT: control target
= control target key end

     0   :  { %s91_s0 = inlined_call_operand.<no memory space> [shape: f32[1,1], index: 0, kind: input, shape index: {}]   ;;  %s92_s1 = inlined_call_operand.vmem [shape: f32[1,128], index: 1, kind: input, shape index: {}]   ;;  %s93_s2 = inlined_call_operand.hbm [shape: f32[1,128], index: 2, kind: output, shape index: {}]  }
   0x1   :  { %v13_v0 = vld [vmem:[%s92_s1] sm:$0x1]  ;;  %v15_v1 = vstv %s91_s0 }
   0x2   :  { %8 = vsyncpa [#allocation4], 0  ;;  %v16_v2 = vmul.f32 %v15_v1, %v13_v0  ;;  %s57_s13 = smov [#allocation3]  }
   0x3   :  { %s24_s14 = sshll.u32 %s57_s13, 4  ;;  %s25_s14 = int_to_ptr.vmem [resolvable:$true] %s24_s14 }
   0x4   :  { %17 = vst [vmem:[#allocation3] sm:$0x1] %v16_v2  ;;  %s33_s15 = scalar_lea.vmem %s25_s14, 16  ;;  %s37_s16 = scalar_lea.vmem %s25_s14, 32 }
   0x5   :  { %p34_p0 = scmp.ne.s32.totalorder %s25_s14, %s33_s15  ;;  %p38_p1 = scmp.lt.s32.totalorder %s25_s14, %s25_s14 }
   0x6   :  { %p39_p2 = scmp.lt.s32.totalorder %s37_s16, %s33_s15 }
   0x8   :  { %p40_p3 = por %p39_p2, %p38_p1 }
   0xa   :  { %p41_p4 = pnand %p40_p3, %p34_p0 }
   0xc   :  { %44 = shalt.err (!%p41_p4)
}
   0xd   :  { %s45_s18 = scalar_lea.hbm %s93_s2, 16 }
   0xe   :  { %p46_p5 = scmp.ne.s32.totalorder %s93_s2, %s45_s18  ;;  %p49_p6 = scmp.lt.u32.totalorder %s45_s18, %s93_s2 }
  0x10   :  { %p51_p7 = pnand %p49_p6, %p46_p5 }
  0x12   :  { %54 = shalt.err (!%p51_p7)
}
  0x13   :  { %27 = dma.vmem_to_hbm [thread:$0]  %s25_s14, 16, %s93_s2, [#allocation4]  }
  0x14   :  { %55 = dma.done.wait [#allocation4], 16  }
  0x15   :  { %56 = vsyncadd [#allocation4], 4294967280 }
  0x16   :  { %31 = vsyncpa [#allocation4], 1 }

</bundles_post_ra>
